<compile_context>
chip_gen: v5e
topology: v5e:2x2
jax: 0.10.0
libtpu: 0.0.40
codegen_flags: <defaults>
</compile_context>

<pallas_src>
import functools

import jax
import jax.numpy as jnp
from jax.experimental import pallas as pl
from jax.experimental.pallas import tpu as pltpu


def _encode_kernel(p_ref, w_ref, b_ref, o_ref, *, k):
    """p_ref: (4*k, TL)   w_ref: (Cout, k)   b_ref: (Cout, 1)   o_ref: (Cout, TL)

    4 lane-dense matmuls (one per pool position, static sublane slices of p),
    running element-wise max, then a single bias-add + ReLU.
    """
    w = w_ref[...]                                     # (Cout, k), resident
    acc = jnp.dot(w, p_ref[0:k, :], preferred_element_type=jnp.float32)
    for i in range(1, 4):                              # static unroll: 3 more pool positions
        y = jnp.dot(w, p_ref[i * k:(i + 1) * k, :],
                    preferred_element_type=jnp.float32)
        acc = jnp.maximum(acc, y)
    # bias + ReLU once, after the pool-max (identical result, 1/4 the VPU work)
    o_ref[...] = jnp.maximum(acc + b_ref[...], 0.0).astype(o_ref.dtype)


def _pick_lane_tile(total, col_bytes, cout, vmem_budget_bytes, need_multi):
    """Pick the largest 128-multiple lane tile that fits the VMEM double-buffer
    budget and the f32-accumulator (vreg) bound; guarantees >= 2 grid steps when
    requested and possible.  Returns (tile, padded_total)."""
    t_vmem = max(128, (vmem_budget_bytes // max(col_bytes, 1)) // 128 * 128)
    t_acc = max(128, (128 * 1024 // (8 * max(cout, 1))) // 128 * 128)
    t = min(t_vmem, t_acc, 2048)
    if total <= 128 or (total <= t and not need_multi):
        return total, total                            # single full-extent block, no padding
    if need_multi:                                     # >= 2 parallel steps for v7x's 2 TCs
        while t > 128 and -(-total // t) < 2:
            t -= 128
    t = min(t, -(-total // 128) * 128)
    padded = -(-total // t) * t                        # no divisibility cliff: pad up to tile
    return t, padded


def encode_layer(x, conv_w, conv_b, *, compute_dtype=jnp.bfloat16,
                 vmem_budget_bytes=24 * 1024 * 1024):
    """Pallas implementation of EncodeLayer.forward.

    x:      [N, C_in, H, W]   (NCHW; H and W divisible by 4)
    conv_w: [C_out, C_in, 2, 2]
    conv_b: [C_out]
    returns [N, C_out, H//4, W//4]
    """
    N, Cin, H, W = x.shape
    if H % 4 or W % 4:
        raise ValueError("H and W must be divisible by 4 (conv stride 2 + pool 2)")
    Cout = conv_w.shape[0]
    Hp, Wp = H // 4, W // 4
    M = Hp * Wp                                        # pooled spatial size per image
    K = Cin * 4                                        # conv patch size (contraction)
    K4 = 4 * K                                         # 4 pool positions merged into sublanes
    cdt = jnp.dtype(compute_dtype) if compute_dtype is not None else x.dtype
    out_dtype = x.dtype

    # --- im2col glue: pool positions on sublanes, pooled spatial on lanes ------
    # x -> axes (N, ci, hp, ph, kh, wp, pw, kw); patch sublane index order is
    # (ph, pw, ci, kh, kw) so conv_w.reshape(Cout, K) matches k = (ci, kh, kw).
    xp = x.reshape(N, Cin, Hp, 2, 2, Wp, 2, 2)
    w_mat = conv_w.reshape(Cout, K).astype(cdt)
    b_mat = conv_b.reshape(Cout, 1).astype(jnp.float32)

    in_item = jnp.dtype(cdt).itemsize
    out_item = jnp.dtype(out_dtype).itemsize
    # double-buffered VMEM bytes per output lane column (input block + output block)
    col_bytes = 2 * (K4 * in_item + Cout * out_item)

    compiler_kw = dict(
        # scoped VMEM limit consistent with our own double-buffer math
        # (<= 64 MiB physical on v7x; plenty of headroom on v5e/v6e's 128 MiB)
        vmem_limit_bytes=int(vmem_budget_bytes + (2 << 20)),
        # let XLA fuse the im2col transpose/reshape (+ cast) into the patch
        # tensor's input DMA instead of materializing it in HBM
        allow_input_fusion=[True, False, False],
    )
    kern = functools.partial(_encode_kernel, k=K)

    if (M < 512) or (N == 1):
        # ---- folded path: lanes = (n, hp, wp); wide lane-dense stores ----------
        L = N * M
        p = xp.transpose(3, 6, 1, 4, 7, 0, 2, 5).reshape(K4, L).astype(cdt)
        tl, Lk = _pick_lane_tile(L, col_bytes, Cout, vmem_budget_bytes,
                                 need_multi=True)
        if Lk != L:
            p = jnp.pad(p, ((0, 0), (0, Lk - L)))
        out = pl.pallas_call(
            kern,
            out_shape=jax.ShapeDtypeStruct((Cout, Lk), out_dtype),
            grid_spec=pltpu.PrefetchScalarGridSpec(
                num_scalar_prefetch=0,
                grid=(Lk // tl,),
                in_specs=[
                    pl.BlockSpec((K4, tl), lambda m: (0, m)),
                    pl.BlockSpec((Cout, K), lambda m: (0, 0)),   # resident, no re-DMA
                    pl.BlockSpec((Cout, 1), lambda m: (0, 0)),   # resident, no re-DMA
                ],
                out_specs=pl.BlockSpec((Cout, tl), lambda m: (0, m)),
            ),
            compiler_params=pltpu.CompilerParams(
                dimension_semantics=("parallel",), **compiler_kw),
        )(p, w_mat, b_mat)
        # lanes were (n, hp, wp): cheap XLA transpose back to NCHW (tiny output)
        return out[:, :L].reshape(Cout, N, Hp, Wp).transpose(1, 0, 2, 3)

    # ---- batched path: lanes = (hp, wp) per image; no output transpose --------
    p = xp.transpose(0, 3, 6, 1, 4, 7, 2, 5).reshape(N, K4, M).astype(cdt)
    tm, Mk = _pick_lane_tile(M, col_bytes, Cout, vmem_budget_bytes,
                             need_multi=(N < 2))
    if Mk != M:
        p = jnp.pad(p, ((0, 0), (0, 0), (0, Mk - M)))
    out = pl.pallas_call(
        kern,
        out_shape=jax.ShapeDtypeStruct((N, Cout, Mk), out_dtype),
        grid_spec=pltpu.PrefetchScalarGridSpec(
            num_scalar_prefetch=0,
            grid=(N, Mk // tm),
            in_specs=[
                pl.BlockSpec((pl.Squeezed(), K4, tm), lambda n, m: (n, 0, m)),
                pl.BlockSpec((Cout, K), lambda n, m: (0, 0)),    # resident, no re-DMA
                pl.BlockSpec((Cout, 1), lambda n, m: (0, 0)),    # resident, no re-DMA
            ],
            out_specs=pl.BlockSpec((pl.Squeezed(), Cout, tm), lambda n, m: (n, 0, m)),
        ),
        compiler_params=pltpu.CompilerParams(
            dimension_semantics=("parallel", "parallel"), **compiler_kw),
    )(p, w_mat, b_mat)
    # lanes = (hp, wp): slice off lane padding, reshape straight back to NCHW
    return out[:, :, :M].reshape(N, Cout, Hp, Wp)


def reference(x, conv_w, conv_b):
    """Pure-JAX reference of the PyTorch forward pass."""
    y = jax.lax.conv_general_dilated(
        x, conv_w, window_strides=(2, 2), padding="VALID",
        dimension_numbers=("NCHW", "OIHW", "NCHW"))
    y = jnp.maximum(y + conv_b.reshape(1, -1, 1, 1), 0.0)
    y = jax.lax.reduce_window(
        y, -jnp.inf, jax.lax.max,
        window_dimensions=(1, 1, 2, 2), window_strides=(1, 1, 2, 2),
        padding="VALID")
    return y


if __name__ == "__main__":
    key = jax.random.PRNGKey(0)
    kx, kw, kb, kx2 = jax.random.split(key, 4)

    # small shapes consistent with the module
    N, Cin, Cout, H, W = 2, 4, 8, 16, 16
    x = jax.random.normal(kx, (N, Cin, H, W), dtype=jnp.float32)
    fan_in = Cin * 2 * 2
    bound = 1.0 / (fan_in ** 0.5)
    conv_w = jax.random.uniform(kw, (Cout, Cin, 2, 2), jnp.float32, -bound, bound)
    conv_b = jax.random.uniform(kb, (Cout,), jnp.float32, -bound, bound)

    enc = jax.jit(encode_layer,
                  static_argnames=("compute_dtype", "vmem_budget_bytes"))
    ref = reference(x, conv_w, conv_b)

    # f32 path (folded small-image kernel): near-exact vs the XLA reference
    out_f32 = jax.block_until_ready(enc(x, conv_w, conv_b, compute_dtype=jnp.float32))
    assert out_f32.shape == (N, Cout, H // 4, W // 4), out_f32.shape
    assert jnp.allclose(out_f32, ref, atol=1e-5, rtol=1e-5), "f32 mismatch vs reference"

    # default path: bf16 activations/weights, f32 accumulation (half HBM traffic)
    out_bf16 = jax.block_until_ready(enc(x, conv_w, conv_b))
    assert out_bf16.shape == (N, Cout, H // 4, W // 4), out_bf16.shape
    assert jnp.allclose(out_bf16, ref, atol=5e-2, rtol=5e-2), "bf16 mismatch vs reference"

    # larger spatial extent exercising the batched (no-output-transpose) path
    H2 = W2 = 96                                       # M = 24*24 = 576 >= 512
    x2 = jax.random.normal(kx2, (N, Cin, H2, W2), dtype=jnp.float32)
    ref2 = reference(x2, conv_w, conv_b)
    out2 = jax.block_until_ready(enc(x2, conv_w, conv_b))
    assert out2.shape == (N, Cout, H2 // 4, W2 // 4), out2.shape
    assert jnp.allclose(out2, ref2, atol=5e-2, rtol=5e-2), "bf16 batched-path mismatch"

    print("KERNEL_OK")
</pallas_src>

<mosaic_0001>
module attributes {stable_mosaic.version = 11 : i64} {
  func.func @_encode_kernel(%arg0: i32, %arg1: memref<64x32xf32, #tpu.memory_space<vmem>>, %arg2: memref<8x16xf32, #tpu.memory_space<vmem>>, %arg3: memref<8x1xf32, #tpu.memory_space<vmem>>, %arg4: memref<8x32xf32, #tpu.memory_space<vmem>>) attributes {dimension_semantics = [#tpu.dimension_semantics<parallel>], iteration_bounds = array<i64: 1>, scalar_prefetch = 0 : i64, scratch_operands = 0 : i64, tpu.core_type = #tpu.core_type<tc>, window_params = [{transform_indices = @transform_0, window_bounds = array<i64: 64, 32>}, {pipeline_mode = #tpu.pipeline_mode<synchronous>, transform_indices = @transform_1, window_bounds = array<i64: 8, 16>}, {pipeline_mode = #tpu.pipeline_mode<synchronous>, transform_indices = @transform_2, window_bounds = array<i64: 8, 1>}, {transform_indices = @transform_3, window_bounds = array<i64: 8, 32>}]} {
    %c0 = arith.constant 0 : index
    %c0_0 = arith.constant 0 : index
    %0 = vector.load %arg2[%c0, %c0_0] : memref<8x16xf32, #tpu.memory_space<vmem>>, vector<8x16xf32>
    %c0_1 = arith.constant 0 : index
    %c0_2 = arith.constant 0 : index
    %1 = vector.load %arg1[%c0_1, %c0_2] : memref<64x32xf32, #tpu.memory_space<vmem>>, vector<16x32xf32>
    %cst = arith.constant dense<0.000000e+00> : vector<8x32xf32>
    %2 = tpu.matmul %0, %1, %cst {dimension_numbers = #tpu.dot_dimension_numbers<[1], [0], [0], [1], [0, 0, 1, 1], [], []>} : vector<8x16xf32>, vector<16x32xf32>, vector<8x32xf32> -> vector<8x32xf32>
    %c16 = arith.constant 16 : index
    %c0_3 = arith.constant 0 : index
    %3 = vector.load %arg1[%c16, %c0_3] : memref<64x32xf32, #tpu.memory_space<vmem>>, vector<16x32xf32>
    %cst_4 = arith.constant dense<0.000000e+00> : vector<8x32xf32>
    %4 = tpu.matmul %0, %3, %cst_4 {dimension_numbers = #tpu.dot_dimension_numbers<[1], [0], [0], [1], [0, 0, 1, 1], [], []>} : vector<8x16xf32>, vector<16x32xf32>, vector<8x32xf32> -> vector<8x32xf32>
    %5 = arith.maximumf %2, %4 : vector<8x32xf32>
    %c32 = arith.constant 32 : index
    %c0_5 = arith.constant 0 : index
    %6 = vector.load %arg1[%c32, %c0_5] : memref<64x32xf32, #tpu.memory_space<vmem>>, vector<16x32xf32>
    %cst_6 = arith.constant dense<0.000000e+00> : vector<8x32xf32>
    %7 = tpu.matmul %0, %6, %cst_6 {dimension_numbers = #tpu.dot_dimension_numbers<[1], [0], [0], [1], [0, 0, 1, 1], [], []>} : vector<8x16xf32>, vector<16x32xf32>, vector<8x32xf32> -> vector<8x32xf32>
    %8 = arith.maximumf %5, %7 : vector<8x32xf32>
    %c48 = arith.constant 48 : index
    %c0_7 = arith.constant 0 : index
    %9 = vector.load %arg1[%c48, %c0_7] : memref<64x32xf32, #tpu.memory_space<vmem>>, vector<16x32xf32>
    %cst_8 = arith.constant dense<0.000000e+00> : vector<8x32xf32>
    %10 = tpu.matmul %0, %9, %cst_8 {dimension_numbers = #tpu.dot_dimension_numbers<[1], [0], [0], [1], [0, 0, 1, 1], [], []>} : vector<8x16xf32>, vector<16x32xf32>, vector<8x32xf32> -> vector<8x32xf32>
    %11 = arith.maximumf %8, %10 : vector<8x32xf32>
    %c0_9 = arith.constant 0 : index
    %c0_10 = arith.constant 0 : index
    %12 = vector.load %arg3[%c0_9, %c0_10] : memref<8x1xf32, #tpu.memory_space<vmem>>, vector<8x1xf32>
    %13 = vector.broadcast %12 : vector<8x1xf32> to vector<8x32xf32>
    %14 = arith.addf %11, %13 : vector<8x32xf32>
    %cst_11 = arith.constant 0.000000e+00 : f32
    %15 = vector.broadcast %cst_11 : f32 to vector<8x32xf32>
    %16 = arith.maximumf %14, %15 : vector<8x32xf32>
    %c0_12 = arith.constant 0 : index
    %c0_13 = arith.constant 0 : index
    %17 = vector.load %arg4[%c0_12, %c0_13] : memref<8x32xf32, #tpu.memory_space<vmem>>, vector<8x32xf32>
    tpu.vector_store %arg4[%c0_12, %c0_13], %16 {strides = array<i32>} : memref<8x32xf32, #tpu.memory_space<vmem>>, vector<8x32xf32>,
    return
  }
  func.func @transform_0(%arg0: i32) -> (i32, i32) {
    %c0_i32 = arith.constant 0 : i32
    %c0_i32_0 = arith.constant 0 : i32
    return %c0_i32, %arg0 : i32, i32
  }
  func.func @transform_1(%arg0: i32) -> (i32, i32) {
    %c0_i32 = arith.constant 0 : i32
    %c0_i32_0 = arith.constant 0 : i32
    %c0_i32_1 = arith.constant 0 : i32
    return %c0_i32, %c0_i32_0 : i32, i32
  }
  func.func @transform_2(%arg0: i32) -> (i32, i32) {
    %c0_i32 = arith.constant 0 : i32
    %c0_i32_0 = arith.constant 0 : i32
    %c0_i32_1 = arith.constant 0 : i32
    return %c0_i32, %c0_i32_0 : i32, i32
  }
  func.func @transform_3(%arg0: i32) -> (i32, i32) {
    %c0_i32 = arith.constant 0 : i32
    %c0_i32_0 = arith.constant 0 : i32
    return %c0_i32, %arg0 : i32, i32
  }
}

</mosaic_0001>

<bundles_post_ra>
// kernel: encode_layer.1
= control target key start
LH: loop header
LB: loop body
LE: loop exit
PB: predicated region body
PF: predicated region fallthrough
CT: control target
= control target key end

     0   :  { %v130_v3 = vmov 0   ;;  %vm17_vm0 = vcmask 130048   ;;  %vm118_vm1 = vcmask 261120   ;;  %s188_s0 = inlined_call_operand.vmem [shape: f32[64,32], index: 0, kind: input, shape index: {}]   ;;  %s189_s1 = inlined_call_operand.vmem [shape: f32[8,16], index: 1, kind: input, shape index: {}]   ;;  %s190_s2 = inlined_call_operand.vmem [shape: f32[8,1], index: 2, kind: input, shape index: {}]   ;;  %s191_s3 = inlined_call_operand.vmem [shape: f32[8,32], index: 3, kind: output, shape index: {}]  }
   0x1   :  { %v65_v0 = vld [vmem:[%s188_s0 + $0x28] sm:$0xff]  ;;  %v64_v1 = vld [vmem:[%s188_s0 + $0x20] sm:$0xff]  ;;  %v88_v2 = vld [vmem:[%s188_s0 + $0x38] sm:$0xff]  ;;  %129 = vset.pattern.permute.xlu0 %v130_v3 }
   0x2   :  { %80 = vmatpush.msra.mxu2 %v65_v0  ;;  %103 = vmatpush.msra.mxu3 %v88_v2  ;;  %v14_v4 = vld [vmem:[%s189_s1] sm:$0xff]  ;;  %v16_v5 = vld [vmem:[%s188_s0 + $0x8] sm:$0xff]  ;;  %v42_v6 = vld [vmem:[%s188_s0 + $0x18] sm:$0xff] }
   0x3   :  { %35 = vmatpush.msra.mxu0 %v16_v5  ;;  %57 = vmatpush.msra.mxu1 %v42_v6  ;;  %v87_v7 = vld [vmem:[%s188_s0 + $0x30] sm:$0xff]  ;;  %v15_v8 = vld [vmem:[%s188_s0] sm:$0xff] }
   0x4   :  { %v41_v9 = vld [vmem:[%s188_s0 + $0x10] sm:$0xff]  ;;  %81 = vmatpush.msra.mxu2 %v64_v1  ;;  %104 = vmatpush.msra.mxu3 %v87_v7  ;;  %v110_v10 = vld [vmem:[%s190_s2] sm:$0xff] }
   0x5   :  { %126 = vmatmul.msk.f32.vlgmr.msra.gmra.mxu2 %vm17_vm0, %v14_v4  ;;  %127 = vmatmul.msk.f32.vlgmr.msra.gmra.mxu3 %vm17_vm0, %v14_v4 }
   0x6   :  { %36 = vmatpush.msra.mxu0 %v15_v8  ;;  %58 = vmatpush.msra.mxu1 %v41_v9 }
   0x7   :  { %124 = vmatmul.msk.f32.vlgmr.msra.gmra.mxu0 %vm17_vm0, %v14_v4  ;;  %125 = vmatmul.msk.f32.vlgmr.msra.gmra.mxu1 %vm17_vm0, %v14_v4 }
   0x8   :  { %113 = vperm.xlu0 %129, %v110_v10  }
  0x7a   :  { %v114_v17 = vpop.permute.xlu0 %113 }
  0x84   :  { %v38_v11 = vpop.f32.mrf.mxu0  ;;  %v60_v12 = vpop.f32.mrf.mxu1 }
  0x85   :  { %v63_v13 = vmax.f32 %v38_v11, %v60_v12 }
  0x88   :  { %v83_v14 = vpop.f32.mrf.mxu2  ;;  %v106_v15 = vpop.f32.mrf.mxu3 }
  0x89   :  { %v86_v16 = vmax.f32 %v63_v13, %v83_v14 }
  0x8b   :  { %v109_v18 = vmax.f32 %v86_v16, %v106_v15 }
  0x8d   :  { %v116_v19 = vadd.f32 %v114_v17, %v109_v18 }
  0x8f   :  { %v117_v20 = vmax.f32 %v116_v19, 0.0 }
  0x91   :  { %119 = vst.msk [vmem:[%s191_s3] sm:$0xff] %vm118_vm1, %v117_v20 }

</bundles_post_ra>
